<compile_context>
chip_gen: v7x
topology: tpu7x:2x2x1
jax: 0.10.0
libtpu: 0.0.40
codegen_flags: <defaults>
</compile_context>

<pallas_src>
import functools

import jax
import jax.numpy as jnp
from jax import lax
from jax.experimental import pallas as pl
from jax.experimental.pallas import tpu as pltpu

# Contract the last (in_features) axis of both operands: out = lhs @ rhs^T.
_TRANS_B_DIMS = (((1,), (1,)), ((), ()))


def _log_sigmoid(x):
    # Numerically stable logsigmoid(x) = min(x, 0) - log1p(exp(-|x|)),
    # matching torch.nn.functional.logsigmoid semantics.
    return jnp.minimum(x, 0.0) - jnp.log1p(jnp.exp(-jnp.abs(x)))


def dqn_kernel(x_ref, w1_ref, b1_ref, w2_ref, b2_ref, w3_ref, b3_ref, o_ref):
    # x_ref : [tile_b, in_features]  (native layout; one contiguous HBM DMA)
    # w*_ref: [out, in] (PyTorch layout),  b*_ref: [out, 1]
    # o_ref : [out_features, tile_b] (batch on lanes -> lane-dense stores)
    x = x_ref[...].astype(jnp.float32)  # t = t.float()

    # h1^T = W1 @ x^T : contract in_features of both operands so the result is
    # [4, tile_b] batch-on-lane without ever materializing x^T in HBM or VMEM.
    h1 = lax.dot_general(w1_ref[...], x, _TRANS_B_DIMS,
                         preferred_element_type=jnp.float32) + b1_ref[...]
    h1 = _log_sigmoid(h1)

    h2 = jnp.dot(w2_ref[...], h1, preferred_element_type=jnp.float32) + b2_ref[...]
    h2 = _log_sigmoid(h2)

    out = jnp.dot(w3_ref[...], h2, preferred_element_type=jnp.float32) + b3_ref[...]
    o_ref[...] = out.astype(o_ref.dtype)


def _round_up(x, m):
    return ((x + m - 1) // m) * m


@functools.partial(jax.jit, static_argnames=("tile_b",))
def dqn_forward(x, w1, b1, w2, b2, w3, b3, tile_b=8192):
    """x: [B, in_features] (PyTorch convention). Returns [B, out_features]."""
    B, in_features = x.shape
    out_features = w3.shape[0]

    # Tile selection:
    #  - small B: single block == full array dims (no 128-divisibility needed),
    #  - moderate B: split into >=2 lane-aligned tiles so v7x megacore can
    #    shard the (parallel) batch axis across both TensorCores,
    #  - large B: user tile_b, rounded up to the 128-lane width.
    if B > tile_b:
        tb = _round_up(tile_b, 128)
    elif B >= 2048:
        tb = _round_up(-(-B // 2), 128)
    else:
        tb = B
    num_tiles = -(-B // tb)  # ragged tail handled by Pallas edge-block masking

    # Explicit VMEM budget: 2 double-buffered x tiles + 2 out tiles + resident
    # weights (lane/sublane padding included), with headroom.  Keeps big tiles
    # deliberate on v7x's 64 MiB physical / 32 MiB scoped-default VMEM.
    x_tile_vmem = _round_up(tb, 8) * _round_up(in_features, 128) * 4
    out_tile_vmem = _round_up(out_features, 8) * _round_up(tb, 128) * 4
    vmem_limit = min(
        max(2 * (x_tile_vmem + out_tile_vmem) + (2 << 20), 16 << 20), 48 << 20)

    # Weights / biases: constant block index -> DMA'd once, stay VMEM-resident.
    const = lambda shape: pl.BlockSpec(shape, lambda i: (0,) * len(shape))

    outT = pl.pallas_call(
        dqn_kernel,
        out_shape=jax.ShapeDtypeStruct((out_features, B), jnp.float32),
        grid=(num_tiles,),
        in_specs=[
            # x in native [B, in_features] layout, pipelined over the batch.
            pl.BlockSpec((tb, in_features), lambda i: (i, 0)),
            const(w1.shape), const(b1.shape),
            const(w2.shape), const(b2.shape),
            const(w3.shape), const(b3.shape),
        ],
        out_specs=pl.BlockSpec((out_features, tb), lambda i: (0, i)),
        compiler_params=pltpu.CompilerParams(
            # Batch axis is fully independent -> megacore sharding on v7x
            # (no-op on single-TC v5e/v6e, kept only for v7x).
            dimension_semantics=("parallel",),
            vmem_limit_bytes=vmem_limit,
        ),
    )(x, w1, b1, w2, b2, w3, b3)

    # out_features is tiny (e.g. 4): one cheap XLA transpose of [out, B] is
    # cheaper than lane-sparse in-kernel stores of [tile_b, out] blocks.
    return outT.T


def init_dqn_params(key, input_size, output_size):
    """PyTorch nn.Linear default init: U(-1/sqrt(fan_in), 1/sqrt(fan_in)).
    Weights in PyTorch layout [out, in]; biases as columns [out, 1]."""
    def linear(k, fan_in, fan_out):
        kw, kb = jax.random.split(k)
        bound = 1.0 / jnp.sqrt(jnp.float32(fan_in))
        w = jax.random.uniform(kw, (fan_out, fan_in), jnp.float32, -bound, bound)
        b = jax.random.uniform(kb, (fan_out, 1), jnp.float32, -bound, bound)
        return w, b

    k1, k2, k3 = jax.random.split(key, 3)
    w1, b1 = linear(k1, input_size, 4)
    w2, b2 = linear(k2, 4, 4)
    w3, b3 = linear(k3, 4, output_size)
    return w1, b1, w2, b2, w3, b3


def dqn_reference(x, w1, b1, w2, b2, w3, b3):
    x = x.astype(jnp.float32)
    h1 = _log_sigmoid(x @ w1.T + b1[:, 0])
    h2 = _log_sigmoid(h1 @ w2.T + b2[:, 0])
    return h2 @ w3.T + b3[:, 0]


if __name__ == "__main__":
    key = jax.random.PRNGKey(0)
    k_x, k_x2, k_x3, k_p = jax.random.split(key, 4)

    batch, input_size, output_size = 8, 16, 4
    params = init_dqn_params(k_p, input_size, output_size)

    # 1) Small single-block case.
    x = jax.random.normal(k_x, (batch, input_size), dtype=jnp.float32)
    out = jax.block_until_ready(dqn_forward(x, *params))
    ref = dqn_reference(x, *params)
    assert out.shape == (batch, output_size)
    assert jnp.allclose(out, ref, atol=1e-5, rtol=1e-5)

    # 2) Multi-tile + ragged batch (exercises cdiv grid + edge-block masking).
    x2 = jax.random.normal(k_x2, (1000, input_size), dtype=jnp.float32)
    out2 = jax.block_until_ready(dqn_forward(x2, *params, tile_b=256))
    ref2 = dqn_reference(x2, *params)
    assert out2.shape == (1000, output_size)
    assert jnp.allclose(out2, ref2, atol=1e-5, rtol=1e-5)

    # 3) Moderate batch with default tile: auto-split into >=2 parallel tiles
    #    (both v7x TensorCores get work).
    x3 = jax.random.normal(k_x3, (4096, input_size), dtype=jnp.float32)
    out3 = jax.block_until_ready(dqn_forward(x3, *params))
    ref3 = dqn_reference(x3, *params)
    assert out3.shape == (4096, output_size)
    assert jnp.allclose(out3, ref3, atol=1e-5, rtol=1e-5)

    print("KERNEL_OK")
</pallas_src>

<mosaic_0001>
module attributes {stable_mosaic.version = 11 : i64} {
  func.func @dqn_kernel(%arg0: i32, %arg1: memref<8x16xf32, #tpu.memory_space<vmem>>, %arg2: memref<4x16xf32, #tpu.memory_space<vmem>>, %arg3: memref<4x1xf32, #tpu.memory_space<vmem>>, %arg4: memref<4x4xf32, #tpu.memory_space<vmem>>, %arg5: memref<4x1xf32, #tpu.memory_space<vmem>>, %arg6: memref<4x4xf32, #tpu.memory_space<vmem>>, %arg7: memref<4x1xf32, #tpu.memory_space<vmem>>, %arg8: memref<4x8xf32, #tpu.memory_space<vmem>>) attributes {dimension_semantics = [#tpu.dimension_semantics<parallel>], iteration_bounds = array<i64: 1>, scalar_prefetch = 0 : i64, scratch_operands = 0 : i64, tpu.core_type = #tpu.core_type<tc>, window_params = [{transform_indices = @transform_0, window_bounds = array<i64: 8, 16>}, {pipeline_mode = #tpu.pipeline_mode<synchronous>, transform_indices = @transform_1, window_bounds = array<i64: 4, 16>}, {pipeline_mode = #tpu.pipeline_mode<synchronous>, transform_indices = @transform_2, window_bounds = array<i64: 4, 1>}, {pipeline_mode = #tpu.pipeline_mode<synchronous>, transform_indices = @transform_3, window_bounds = array<i64: 4, 4>}, {pipeline_mode = #tpu.pipeline_mode<synchronous>, transform_indices = @transform_4, window_bounds = array<i64: 4, 1>}, {pipeline_mode = #tpu.pipeline_mode<synchronous>, transform_indices = @transform_5, window_bounds = array<i64: 4, 4>}, {pipeline_mode = #tpu.pipeline_mode<synchronous>, transform_indices = @transform_6, window_bounds = array<i64: 4, 1>}, {transform_indices = @transform_7, window_bounds = array<i64: 4, 8>}]} {
    %c0 = arith.constant 0 : index
    %c0_0 = arith.constant 0 : index
    %0 = vector.load %arg1[%c0, %c0_0] : memref<8x16xf32, #tpu.memory_space<vmem>>, vector<8x16xf32>
    %c0_1 = arith.constant 0 : index
    %c0_2 = arith.constant 0 : index
    %1 = vector.load %arg2[%c0_1, %c0_2] : memref<4x16xf32, #tpu.memory_space<vmem>>, vector<4x16xf32>
    %cst = arith.constant dense<0.000000e+00> : vector<4x8xf32>
    %2 = tpu.matmul %1, %0, %cst {dimension_numbers = #tpu.dot_dimension_numbers<[1], [1], [0], [0], [0, 0, 1, 0], [], []>} : vector<4x16xf32>, vector<8x16xf32>, vector<4x8xf32> -> vector<4x8xf32>
    %c0_3 = arith.constant 0 : index
    %c0_4 = arith.constant 0 : index
    %3 = vector.load %arg3[%c0_3, %c0_4] : memref<4x1xf32, #tpu.memory_space<vmem>>, vector<4x1xf32>
    %4 = vector.broadcast %3 : vector<4x1xf32> to vector<4x8xf32>
    %5 = arith.addf %2, %4 : vector<4x8xf32>
    %cst_5 = arith.constant 0.000000e+00 : f32
    %6 = vector.broadcast %cst_5 : f32 to vector<4x8xf32>
    %7 = arith.minimumf %5, %6 : vector<4x8xf32>
    %8 = math.absf %5 : vector<4x8xf32>
    %cst_6 = arith.constant 0.000000e+00 : f32
    %9 = vector.broadcast %cst_6 : f32 to vector<4x8xf32>
    %10 = arith.subf %9, %8 : vector<4x8xf32>
    %11 = math.exp %10 : vector<4x8xf32>
    %12 = math.log1p %11 : vector<4x8xf32>
    %13 = arith.subf %7, %12 : vector<4x8xf32>
    %c0_7 = arith.constant 0 : index
    %c0_8 = arith.constant 0 : index
    %14 = vector.load %arg4[%c0_7, %c0_8] : memref<4x4xf32, #tpu.memory_space<vmem>>, vector<4x4xf32>
    %cst_9 = arith.constant dense<0.000000e+00> : vector<4x8xf32>
    %15 = tpu.matmul %14, %13, %cst_9 {dimension_numbers = #tpu.dot_dimension_numbers<[1], [0], [0], [1], [0, 0, 1, 1], [], []>} : vector<4x4xf32>, vector<4x8xf32>, vector<4x8xf32> -> vector<4x8xf32>
    %c0_10 = arith.constant 0 : index
    %c0_11 = arith.constant 0 : index
    %16 = vector.load %arg5[%c0_10, %c0_11] : memref<4x1xf32, #tpu.memory_space<vmem>>, vector<4x1xf32>
    %17 = vector.broadcast %16 : vector<4x1xf32> to vector<4x8xf32>
    %18 = arith.addf %15, %17 : vector<4x8xf32>
    %cst_12 = arith.constant 0.000000e+00 : f32
    %19 = vector.broadcast %cst_12 : f32 to vector<4x8xf32>
    %20 = arith.minimumf %18, %19 : vector<4x8xf32>
    %21 = math.absf %18 : vector<4x8xf32>
    %cst_13 = arith.constant 0.000000e+00 : f32
    %22 = vector.broadcast %cst_13 : f32 to vector<4x8xf32>
    %23 = arith.subf %22, %21 : vector<4x8xf32>
    %24 = math.exp %23 : vector<4x8xf32>
    %25 = math.log1p %24 : vector<4x8xf32>
    %26 = arith.subf %20, %25 : vector<4x8xf32>
    %c0_14 = arith.constant 0 : index
    %c0_15 = arith.constant 0 : index
    %27 = vector.load %arg6[%c0_14, %c0_15] : memref<4x4xf32, #tpu.memory_space<vmem>>, vector<4x4xf32>
    %cst_16 = arith.constant dense<0.000000e+00> : vector<4x8xf32>
    %28 = tpu.matmul %27, %26, %cst_16 {dimension_numbers = #tpu.dot_dimension_numbers<[1], [0], [0], [1], [0, 0, 1, 1], [], []>} : vector<4x4xf32>, vector<4x8xf32>, vector<4x8xf32> -> vector<4x8xf32>
    %c0_17 = arith.constant 0 : index
    %c0_18 = arith.constant 0 : index
    %29 = vector.load %arg7[%c0_17, %c0_18] : memref<4x1xf32, #tpu.memory_space<vmem>>, vector<4x1xf32>
    %30 = vector.broadcast %29 : vector<4x1xf32> to vector<4x8xf32>
    %31 = arith.addf %28, %30 : vector<4x8xf32>
    %c0_19 = arith.constant 0 : index
    %c0_20 = arith.constant 0 : index
    %32 = vector.load %arg8[%c0_19, %c0_20] : memref<4x8xf32, #tpu.memory_space<vmem>>, vector<4x8xf32>
    tpu.vector_store %arg8[%c0_19, %c0_20], %31 {strides = array<i32>} : memref<4x8xf32, #tpu.memory_space<vmem>>, vector<4x8xf32>,
    return
  }
  func.func @transform_0(%arg0: i32) -> (i32, i32) {
    %c0_i32 = arith.constant 0 : i32
    %c0_i32_0 = arith.constant 0 : i32
    return %arg0, %c0_i32 : i32, i32
  }
  func.func @transform_1(%arg0: i32) -> (i32, i32) {
    %c0_i32 = arith.constant 0 : i32
    %c0_i32_0 = arith.constant 0 : i32
    %c0_i32_1 = arith.constant 0 : i32
    return %c0_i32, %c0_i32_0 : i32, i32
  }
  func.func @transform_2(%arg0: i32) -> (i32, i32) {
    %c0_i32 = arith.constant 0 : i32
    %c0_i32_0 = arith.constant 0 : i32
    %c0_i32_1 = arith.constant 0 : i32
    return %c0_i32, %c0_i32_0 : i32, i32
  }
  func.func @transform_3(%arg0: i32) -> (i32, i32) {
    %c0_i32 = arith.constant 0 : i32
    %c0_i32_0 = arith.constant 0 : i32
    %c0_i32_1 = arith.constant 0 : i32
    return %c0_i32, %c0_i32_0 : i32, i32
  }
  func.func @transform_4(%arg0: i32) -> (i32, i32) {
    %c0_i32 = arith.constant 0 : i32
    %c0_i32_0 = arith.constant 0 : i32
    %c0_i32_1 = arith.constant 0 : i32
    return %c0_i32, %c0_i32_0 : i32, i32
  }
  func.func @transform_5(%arg0: i32) -> (i32, i32) {
    %c0_i32 = arith.constant 0 : i32
    %c0_i32_0 = arith.constant 0 : i32
    %c0_i32_1 = arith.constant 0 : i32
    return %c0_i32, %c0_i32_0 : i32, i32
  }
  func.func @transform_6(%arg0: i32) -> (i32, i32) {
    %c0_i32 = arith.constant 0 : i32
    %c0_i32_0 = arith.constant 0 : i32
    %c0_i32_1 = arith.constant 0 : i32
    return %c0_i32, %c0_i32_0 : i32, i32
  }
  func.func @transform_7(%arg0: i32) -> (i32, i32) {
    %c0_i32 = arith.constant 0 : i32
    %c0_i32_0 = arith.constant 0 : i32
    return %c0_i32, %arg0 : i32, i32
  }
}

</mosaic_0001>

<bundles_post_ra>
// kernel: dqn_forward.1
= control target key start
LH: loop header
LB: loop body
LE: loop exit
PB: predicated region body
PF: predicated region fallthrough
CT: control target
= control target key end

     0   :  { %vm35_vm0 = vcmask 130048   ;;  %v391_v1 = vmov 0.0   ;;  %vm392_vm1 = vmmov 0   ;;  %v393_v4 = vmov 0   ;;  %s477_s0 = inlined_call_operand.vmem [shape: f32[8,16], index: 0, kind: input, shape index: {}]   ;;  %s478_s1 = inlined_call_operand.vmem [shape: f32[4,16], index: 1, kind: input, shape index: {}]   ;;  %s479_s2 = inlined_call_operand.vmem [shape: f32[4,1], index: 2, kind: input, shape index: {}]   ;;  %s480_s3 = inlined_call_operand.vmem [shape: f32[4,4], index: 3, kind: input, shape index: {}]   ;;  %s481_s4 = inlined_call_operand.vmem [shape: f32[4,1], index: 4, kind: input, shape index: {}]   ;;  %s482_s5 = inlined_call_operand.vmem [shape: f32[4,4], index: 5, kind: input, shape index: {}]   ;;  %s483_s6 = inlined_call_operand.vmem [shape: f32[4,1], index: 6, kind: input, shape index: {}]   ;;  %s484_s7 = inlined_call_operand.hbm [shape: f32[4,8], index: 7, kind: output, shape index: {}]  }
   0x1   :  { %v27_v0 = vld [vmem:[%s477_s0] sm:$0xff]  ;;  %338 = vmatprep.subr.mxu0 %v391_v1  ;;  %340 = vmatprep.mubr.msk.f32.mxu0 %vm392_vm1, %v391_v1 }
   0x2   :  { %v29_v2 = vld [vmem:[%s479_s2] sm:$0xf]  ;;  %339 = vmatpush3.xpose.msk.msra.mxu0 %vm35_vm0, %v27_v0  ;;  %357 = vset.pattern.permute.xlu0 %v393_v4 }
   0x3   :  { %v28_v3 = vld [vmem:[%s478_s1] sm:$0xf] }
   0x4   :  { %12 = vsyncpa [#allocation3], 0  ;;  %32 = vperm.xlu0 %357, %v29_v2   ;;  %343 = vmatprep.subr.mxu1 %v391_v1  ;;  %v128_v5 = vld [vmem:[%s481_s4] sm:$0xf]  ;;  %vm138_vm3 = vcmask 1043456   ;;  %vm134_vm4 = vcmask 31744  }
   0x5   :  { %345 = vmatprep.mubr.msk.f32.mxu1 %vm392_vm1, %v391_v1  ;;  %358 = vset.pattern.permute.xlu1 %v393_v4  ;;  %v127_v24 = vld [vmem:[%s480_s3] sm:$0xf]  ;;  %s394_s9 = smov [#allocation2]   ;;  %vm310_vm6 = vcmask 60416  }
   0x6   :  { %341 = vmatmul.mubr.msk.f32.vlgmr.msra.gmra.mrb[0].mxu0 %vm35_vm0, %v28_v3  ;;  %v228_v25 = vld [vmem:[%s483_s6] sm:$0xf]  ;;  %s318_s10 = sshll.u32 %s394_s9, 4  ;;  %s319_s10 = int_to_ptr.vmem [resolvable:$true] %s318_s10 }
   0x7   :  { %231 = vperm.xlu1 %358, %v228_v25   ;;  %v227_v44 = vld [vmem:[%s482_s5] sm:$0xf]  ;;  %s367_s11 = scalar_lea.vmem %s319_s10, 64  ;;  %p372_p1 = scmp.lt.s32.totalorder %s319_s10, %s319_s10 }
   0x8   :  { %131 = vperm.xlu0 %357, %v128_v5   ;;  %p368_p0 = scmp.ne.s32.totalorder %s319_s10, %s367_s11  ;;  %p373_p2 = scmp.lt.s32.totalorder %s367_s11, %s367_s11 }
   0xa   :  { %p374_p3 = por %p373_p2, %p372_p1 }
   0xc   :  { %p375_p4 = pnand %p374_p3, %p368_p0 }
  0x83   :  { %v33_v6 = vpop.permute.xlu0 %32 }
  0x86   :  { %v232_v45 = vpop.permute.xlu1 %231 }
  0x87   :  { %v132_v26 = vpop.permute.xlu0 %131 }
  0xd9   :  { %v108_v7 = vpop.f32.mrb[0].mxu0 }
  0xda   :  { %v109_v8 = vadd.f32 %v108_v7, %v33_v6  ;;  %v342_v9 = vpop.f32.mrb[1].mxu0 }
  0xdc   :  { %v113_v10 = vand.u32 2147483647, %v109_v8  ;;  %v112_v21 = vmin.f32 %v109_v8, 0.0 }
  0xde   :  { %v114_v11 = vsub.f32 0.0, %v113_v10 }
  0xe0   :  { %v115_v12 = vmul.f32 1.442695, %v114_v11 }
  0xe2   :  { %359 = vpow2.f32 %v115_v12 }
  0xec   :  { %v360_v13 = vpop.eup %359 }
  0xed   :  { %v117_v14 = vadd.f32 1.0, %v360_v13  ;;  %v120_v15 = vmul.f32 -0.5, %v360_v13  ;;  %v123_v17 = vand.u32 2147483647, %v360_v13 }
  0xef   :  { %361 = vlog2.f32 %v117_v14  ;;  %v121_v16 = vadd.f32 1.0, %v120_v15  ;;  %vm124_vm2 = vcmp.lt.f32.partialorder %v123_v17, 0.0004427343 }
  0xf1   :  { %v122_v20 = vmul.f32 %v360_v13, %v121_v16 }
  0xf9   :  { %v362_v18 = vpop.eup %361 }
  0xfa   :  { %v119_v19 = vmul.f32 0.6931472, %v362_v18 }
  0xfc   :  { %v125_v22 = vsel %vm124_vm2, %v122_v20, %v119_v19 }
  0xfd   :  { %v126_v23 = vsub.f32 %v112_v21, %v125_v22 }
  0xff   :  { %344 = vmatpush3.msk.msra.mxu1 %vm138_vm3, %v126_v23 }
 0x100   :  { %346 = vmatmul.mubr.msk.f32.vlgmr.msra.gmra.mrb[0].mxu1 %vm134_vm4, %v127_v24  ;;  %348 = vmatprep.subr.mxu1 %v391_v1 }
 0x101   :  { %350 = vmatprep.mubr.msk.f32.mxu1 %vm392_vm1, %v391_v1 }
 0x1d3   :  { %v208_v27 = vpop.f32.mrb[0].mxu1 }
 0x1d4   :  { %v209_v28 = vadd.f32 %v208_v27, %v132_v26  ;;  %v347_v29 = vpop.f32.mrb[1].mxu1 }
 0x1d6   :  { %v213_v30 = vand.u32 2147483647, %v209_v28  ;;  %v212_v41 = vmin.f32 %v209_v28, 0.0 }
 0x1d8   :  { %v214_v31 = vsub.f32 0.0, %v213_v30 }
 0x1da   :  { %v215_v32 = vmul.f32 1.442695, %v214_v31 }
 0x1dc   :  { %363 = vpow2.f32 %v215_v32 }
 0x1e6   :  { %v364_v33 = vpop.eup %363 }
 0x1e7   :  { %v217_v34 = vadd.f32 1.0, %v364_v33  ;;  %v220_v35 = vmul.f32 -0.5, %v364_v33  ;;  %v223_v37 = vand.u32 2147483647, %v364_v33 }
 0x1e9   :  { %365 = vlog2.f32 %v217_v34  ;;  %v221_v36 = vadd.f32 1.0, %v220_v35  ;;  %vm224_vm5 = vcmp.lt.f32.partialorder %v223_v37, 0.0004427343 }
 0x1eb   :  { %v222_v40 = vmul.f32 %v364_v33, %v221_v36 }
 0x1f3   :  { %v366_v38 = vpop.eup %365 }
 0x1f4   :  { %v219_v39 = vmul.f32 0.6931472, %v366_v38 }
 0x1f6   :  { %v225_v42 = vsel %vm224_vm5, %v222_v40, %v219_v39 }
 0x1f7   :  { %v226_v43 = vsub.f32 %v212_v41, %v225_v42 }
 0x1f9   :  { %349 = vmatpush3.msk.msra.mxu1 %vm138_vm3, %v226_v43 }
 0x1fa   :  { %351 = vmatmul.mubr.msk.f32.vlgmr.msra.gmra.mrb[2].mxu1 %vm134_vm4, %v227_v44 }
 0x2cd   :  { %v306_v46 = vpop.f32.mrb[2].mxu1 }
 0x2ce   :  { %v307_v47 = vadd.f32 %v306_v46, %v232_v45  ;;  %v352_v48 = vpop.f32.mrb[3].mxu1 }
 0x2d0   :  { %311 = vst.msk [vmem:[#allocation2] sm:$0xf] %vm310_vm6, %v307_v47 }
 0x2d1   :  { %378 = shalt.err (!%p375_p4)
}
 0x2d2   :  { %s379_s13 = scalar_lea.hbm %s484_s7, 64 }
 0x2d3   :  { %p380_p5 = scmp.ne.s32.totalorder %s484_s7, %s379_s13  ;;  %p383_p6 = scmp.lt.u32.totalorder %s379_s13, %s484_s7 }
 0x2d5   :  { %p385_p7 = pnand %p383_p6, %p380_p5 }
 0x2d7   :  { %388 = shalt.err (!%p385_p7)
}
 0x2d8   :  { %321 = dma.vmem_to_hbm [thread:$0]  %s319_s10, 64, %s484_s7, [#allocation3]  }
 0x2d9   :  { %389 = dma.done.wait [#allocation3], 64  }
 0x2da   :  { %390 = vsyncadd [#allocation3], 4294967232 }
 0x2db   :  { %325 = vsyncpa [#allocation3], 1 }

</bundles_post_ra>
